<compile_context>
chip_gen: v5e
topology: v5e:2x2
jax: 0.10.0
libtpu: 0.0.40
codegen_flags: <defaults>
</compile_context>

<pallas_src>
import functools

import jax
import jax.numpy as jnp
from jax import lax
from jax.experimental import pallas as pl
from jax.experimental.pallas import tpu as pltpu


def _round_up(x, m):
    return ((x + m - 1) // m) * m


def _doubleconv_kernel(xm_ref, xh_ref, w1_ref, b1_ref, w2_ref, b2_ref, o_ref):
    # xm_ref: (1, C_in, TILE_L)   main input tile (compute dtype)
    # xh_ref: (1, C_in, 128)      right halo: the next 128 input columns
    # w1_ref: (3, C_out, C_in)    conv1 weights, one (C_out, C_in) matrix per tap
    # b1_ref: (C_out, 1)          f32
    # w2_ref: (3, C_out, C_out)
    # b2_ref: (C_out, 1)          f32
    # o_ref:  (1, C_out, TILE_L)
    tile_l = o_ref.shape[2]
    xw = jnp.concatenate([xm_ref[0], xh_ref[0]], axis=1)   # (C_in, TILE_W), TILE_W = TILE_L+128
    tile_w = xw.shape[1]

    # Shifted-by-k copy via the XLU (roll); wrapped-around columns land in the discarded halo.
    def tap(v, k):
        return v if k == 0 else pltpu.roll(v, shift=tile_w - k, axis=1)

    # --- Conv1 over the full haloed window: three accumulated MXU dots (K = C_in each).
    h = jnp.dot(w1_ref[0], xw, preferred_element_type=jnp.float32)
    h = h + jnp.dot(w1_ref[1], tap(xw, 1), preferred_element_type=jnp.float32)
    h = h + jnp.dot(w1_ref[2], tap(xw, 2), preferred_element_type=jnp.float32)
    h = jnp.maximum(h + b1_ref[...], 0.0)                  # (C_out, TILE_W) f32
    hc = h.astype(xw.dtype)                                 # back to compute dtype for the MXU

    # --- Conv2: only TILE_L output columns (lane-aligned slices -> free), no halo overcompute.
    y = jnp.dot(w2_ref[0], hc[:, :tile_l], preferred_element_type=jnp.float32)
    y = y + jnp.dot(w2_ref[1], tap(hc, 1)[:, :tile_l], preferred_element_type=jnp.float32)
    y = y + jnp.dot(w2_ref[2], tap(hc, 2)[:, :tile_l], preferred_element_type=jnp.float32)
    y = jnp.maximum(y + b2_ref[...], 0.0)                   # (C_out, TILE_L) f32

    o_ref[0] = y.astype(o_ref.dtype)                         # full unmasked lane-dense store


def _pick_tile_l(l_out, c_in, c_out, itemsize, budget):
    """Largest 128-multiple tile whose estimated per-step VMEM footprint fits `budget`."""
    cap = max(128, _round_up(l_out, 128))
    for t in (2048, 1024, 512, 256, 128):
        if t > min(2048, cap):
            continue
        tw = t + 128
        est = (
            2 * c_in * t * itemsize            # double-buffered main input tile
            + 2 * c_in * 128 * itemsize        # double-buffered halo tile
            + 2 * c_out * t * 4                # double-buffered output tile
            + 2 * 3 * c_in * c_out * itemsize  # conv1 weights (double-buffered)
            + 2 * 3 * c_out * c_out * itemsize # conv2 weights (double-buffered)
            + 3 * c_in * tw * itemsize         # xw + two rolled copies
            + c_out * tw * (4 + itemsize)      # h (f32) + hc (compute dtype)
            + c_out * t * (2 * itemsize + 4)   # rolled/sliced hc copies + y (f32)
        )
        if est <= budget:
            return t
    return 128


@functools.partial(jax.jit, static_argnames=("compute_dtype", "tile_l"))
def doubleconv_33(x, w1, b1, w2, b2, *, compute_dtype=None, tile_l=None):
    """x: (N, C_in, L); w1: (C_out, C_in, 3); b1: (C_out,);
    w2: (C_out, C_out, 3); b2: (C_out,). Returns (N, C_out, L-4) in x.dtype."""
    N, C_in, L = x.shape
    C_out = w1.shape[0]
    L_out = L - 4
    assert L_out > 0, "sequence length must be > 4 for two valid k=3 convs"

    # Auto compute dtype: bf16 MXU inputs (f32 accumulate) once channels are wide enough that
    # the traffic win dominates; tiny channel counts stay f32 (exact, padding-free anyway).
    if compute_dtype is None:
        compute_dtype = jnp.bfloat16 if min(C_in, C_out) >= 16 else jnp.float32
    compute_dtype = jnp.dtype(compute_dtype)
    itemsize = compute_dtype.itemsize

    # Generation-aware VMEM budgeting: ~48 MiB limit on v7x (64 MiB/TC), ~96-100 MiB on
    # v5e/v6e (128 MiB). Tile picker gets half the limit as its footprint budget.
    try:
        vmem_cap = int(pltpu.get_tpu_info().vmem_capacity_bytes)
    except Exception:
        vmem_cap = 64 * 1024 * 1024
    vmem_limit = max(32 * 1024 * 1024, min((vmem_cap * 3) // 4, 100 * 1024 * 1024))
    budget = vmem_limit // 2

    if tile_l is None:
        tile_l = _pick_tile_l(L_out, C_in, C_out, itemsize, budget)
    assert tile_l % 128 == 0 and tile_l >= 128
    halo = 128
    # Two valid k=3 convs consume 4 extra input columns; the roll wraparound garbage must stay
    # inside the discarded halo columns.
    assert halo >= 4

    nL = -(-L_out // tile_l)
    L_out_p = nL * tile_l
    L_in_p = L_out_p + halo
    hpb = tile_l // 128                       # halo block index stride (in 128-col blocks)

    # One cheap pad (cast + zero-extend along length). No channel padding, no halo duplication.
    x_p = jnp.pad(x.astype(compute_dtype), ((0, 0), (0, 0), (0, L_in_p - L)))

    # Weights as (3, C_out, C_in): w_t[k][o, i] = w[o, i, k]. Biases stay f32.
    w1_t = jnp.transpose(w1, (2, 0, 1)).astype(compute_dtype)    # (3, C_out, C_in)
    w2_t = jnp.transpose(w2, (2, 0, 1)).astype(compute_dtype)    # (3, C_out, C_out)
    b1_2d = b1.astype(jnp.float32)[:, None]                      # (C_out, 1)
    b2_2d = b2.astype(jnp.float32)[:, None]

    # Put the larger axis first so v7x's 2-TC sharding splits the bigger axis evenly
    # (no-op on single-TC v5e/v6e).
    if N >= nL:
        grid = (N, nL)
        sel = lambda a, b: (a, b)
    else:
        grid = (nL, N)
        sel = lambda a, b: (b, a)

    def xm_map(a, b):
        n, l = sel(a, b)
        return (n, 0, l)

    def xh_map(a, b):
        n, l = sel(a, b)
        return (n, 0, (l + 1) * hpb)

    def w_map(a, b):
        return (0, 0, 0)

    def b_map(a, b):
        return (0, 0)

    def out_map(a, b):
        n, l = sel(a, b)
        return (n, 0, l)

    out_p = pl.pallas_call(
        _doubleconv_kernel,
        out_shape=jax.ShapeDtypeStruct((N, C_out, L_out_p), x.dtype),
        grid_spec=pltpu.PrefetchScalarGridSpec(
            num_scalar_prefetch=0,
            grid=grid,
            in_specs=[
                # Two views of the SAME padded input array: main tile + 128-col right halo.
                pl.BlockSpec((1, C_in, tile_l), xm_map),
                pl.BlockSpec((1, C_in, halo), xh_map),
                # Weights/biases: constant index_map -> fetched once, resident across the grid.
                pl.BlockSpec((3, C_out, C_in), w_map),
                pl.BlockSpec((C_out, 1), b_map),
                pl.BlockSpec((3, C_out, C_out), w_map),
                pl.BlockSpec((C_out, 1), b_map),
            ],
            out_specs=pl.BlockSpec((1, C_out, tile_l), out_map),
        ),
        compiler_params=pltpu.CompilerParams(
            dimension_semantics=("parallel", "parallel"),
            vmem_limit_bytes=vmem_limit,
        ),
    )(x_p, x_p, w1_t, b1_2d, w2_t, b2_2d)

    return out_p[:, :, :L_out]


def _reference(x, w1, b1, w2, b2):
    dn = ("NCH", "OIH", "NCH")
    y = lax.conv_general_dilated(x, w1, (1,), "VALID", dimension_numbers=dn)
    y = jnp.maximum(y + b1[None, :, None], 0.0)
    y = lax.conv_general_dilated(y, w2, (1,), "VALID", dimension_numbers=dn)
    y = jnp.maximum(y + b2[None, :, None], 0.0)
    return y


if __name__ == "__main__":
    N, C_in, C_out, L = 2, 4, 8, 16

    key = jax.random.PRNGKey(0)
    k_x, k_w1, k_b1, k_w2, k_b2 = jax.random.split(key, 5)
    x = jax.random.normal(k_x, (N, C_in, L), dtype=jnp.float32)
    w1 = jax.random.normal(k_w1, (C_out, C_in, 3), dtype=jnp.float32) * 0.1
    b1 = jax.random.normal(k_b1, (C_out,), dtype=jnp.float32) * 0.1
    w2 = jax.random.normal(k_w2, (C_out, C_out, 3), dtype=jnp.float32) * 0.1
    b2 = jax.random.normal(k_b2, (C_out,), dtype=jnp.float32) * 0.1

    ref = _reference(x, w1, b1, w2, b2)

    # f32 path (exact within fp tolerance; auto-picked for small channel counts).
    out = jax.block_until_ready(doubleconv_33(x, w1, b1, w2, b2))
    assert out.shape == (N, C_out, L - 4), out.shape
    assert jnp.allclose(out, ref, atol=1e-5, rtol=1e-5), "f32 mismatch vs reference"

    # bf16-MXU / f32-accumulate path (looser tolerance by construction).
    out_bf16 = jax.block_until_ready(
        doubleconv_33(x, w1, b1, w2, b2, compute_dtype=jnp.bfloat16))
    assert out_bf16.shape == (N, C_out, L - 4), out_bf16.shape
    assert jnp.allclose(out_bf16, ref, atol=1e-1, rtol=1e-1), "bf16 mismatch vs reference"

    print("KERNEL_OK")
</pallas_src>

<mosaic_0001>
module attributes {stable_mosaic.version = 11 : i64} {
  func.func @_doubleconv_kernel(%arg0: i32, %arg1: i32, %arg2: memref<1x4x128xf32, #tpu.memory_space<vmem>>, %arg3: memref<1x4x128xf32, #tpu.memory_space<vmem>>, %arg4: memref<3x8x4xf32, #tpu.memory_space<vmem>>, %arg5: memref<8x1xf32, #tpu.memory_space<vmem>>, %arg6: memref<3x8x8xf32, #tpu.memory_space<vmem>>, %arg7: memref<8x1xf32, #tpu.memory_space<vmem>>, %arg8: memref<1x8x128xf32, #tpu.memory_space<vmem>>) attributes {dimension_semantics = [#tpu.dimension_semantics<parallel>, #tpu.dimension_semantics<parallel>], iteration_bounds = array<i64: 2, 1>, scalar_prefetch = 0 : i64, scratch_operands = 0 : i64, tpu.core_type = #tpu.core_type<tc>, window_params = [{transform_indices = @transform_0, window_bounds = array<i64: 1, 4, 128>}, {transform_indices = @transform_1, window_bounds = array<i64: 1, 4, 128>}, {pipeline_mode = #tpu.pipeline_mode<synchronous>, transform_indices = @transform_2, window_bounds = array<i64: 3, 8, 4>}, {pipeline_mode = #tpu.pipeline_mode<synchronous>, transform_indices = @transform_3, window_bounds = array<i64: 8, 1>}, {pipeline_mode = #tpu.pipeline_mode<synchronous>, transform_indices = @transform_4, window_bounds = array<i64: 3, 8, 8>}, {pipeline_mode = #tpu.pipeline_mode<synchronous>, transform_indices = @transform_5, window_bounds = array<i64: 8, 1>}, {transform_indices = @transform_6, window_bounds = array<i64: 1, 8, 128>}]} {
    %c0 = arith.constant 0 : index
    %c0_0 = arith.constant 0 : index
    %c0_1 = arith.constant 0 : index
    %0 = vector.load %arg2[%c0, %c0_0, %c0_1] : memref<1x4x128xf32, #tpu.memory_space<vmem>>, vector<1x4x128xf32>
    %1 = vector.shape_cast %0 : vector<1x4x128xf32> to vector<4x128xf32>
    %c0_2 = arith.constant 0 : index
    %c0_3 = arith.constant 0 : index
    %c0_4 = arith.constant 0 : index
    %2 = vector.load %arg3[%c0_2, %c0_3, %c0_4] : memref<1x4x128xf32, #tpu.memory_space<vmem>>, vector<1x4x128xf32>
    %3 = vector.shape_cast %2 : vector<1x4x128xf32> to vector<4x128xf32>
    %4 = tpu.concatenate %1, %3 in 1 : vector<4x128xf32>, vector<4x128xf32> -> vector<4x256xf32>
    %c0_5 = arith.constant 0 : index
    %c0_6 = arith.constant 0 : index
    %c0_7 = arith.constant 0 : index
    %5 = vector.load %arg4[%c0_5, %c0_6, %c0_7] : memref<3x8x4xf32, #tpu.memory_space<vmem>>, vector<1x8x4xf32>
    %6 = vector.shape_cast %5 : vector<1x8x4xf32> to vector<8x4xf32>
    %cst = arith.constant dense<0.000000e+00> : vector<8x256xf32>
    %7 = tpu.matmul %6, %4, %cst {dimension_numbers = #tpu.dot_dimension_numbers<[1], [0], [0], [1], [0, 0, 1, 1], [], []>} : vector<8x4xf32>, vector<4x256xf32>, vector<8x256xf32> -> vector<8x256xf32>
    %c1 = arith.constant 1 : index
    %c0_8 = arith.constant 0 : index
    %c0_9 = arith.constant 0 : index
    %8 = vector.load %arg4[%c1, %c0_8, %c0_9] : memref<3x8x4xf32, #tpu.memory_space<vmem>>, vector<1x8x4xf32>
    %9 = vector.shape_cast %8 : vector<1x8x4xf32> to vector<8x4xf32>
    %c255_i32 = arith.constant 255 : i32
    %10 = tpu.dynamic_rotate %4 by %c255_i32 dim 1 : vector<4x256xf32>, i32 -> vector<4x256xf32>
    %cst_10 = arith.constant dense<0.000000e+00> : vector<8x256xf32>
    %11 = tpu.matmul %9, %10, %cst_10 {dimension_numbers = #tpu.dot_dimension_numbers<[1], [0], [0], [1], [0, 0, 1, 1], [], []>} : vector<8x4xf32>, vector<4x256xf32>, vector<8x256xf32> -> vector<8x256xf32>
    %12 = arith.addf %7, %11 : vector<8x256xf32>
    %c2 = arith.constant 2 : index
    %c0_11 = arith.constant 0 : index
    %c0_12 = arith.constant 0 : index
    %13 = vector.load %arg4[%c2, %c0_11, %c0_12] : memref<3x8x4xf32, #tpu.memory_space<vmem>>, vector<1x8x4xf32>
    %14 = vector.shape_cast %13 : vector<1x8x4xf32> to vector<8x4xf32>
    %c254_i32 = arith.constant 254 : i32
    %15 = tpu.dynamic_rotate %4 by %c254_i32 dim 1 : vector<4x256xf32>, i32 -> vector<4x256xf32>
    %cst_13 = arith.constant dense<0.000000e+00> : vector<8x256xf32>
    %16 = tpu.matmul %14, %15, %cst_13 {dimension_numbers = #tpu.dot_dimension_numbers<[1], [0], [0], [1], [0, 0, 1, 1], [], []>} : vector<8x4xf32>, vector<4x256xf32>, vector<8x256xf32> -> vector<8x256xf32>
    %17 = arith.addf %12, %16 : vector<8x256xf32>
    %c0_14 = arith.constant 0 : index
    %c0_15 = arith.constant 0 : index
    %18 = vector.load %arg5[%c0_14, %c0_15] : memref<8x1xf32, #tpu.memory_space<vmem>>, vector<8x1xf32>
    %19 = vector.broadcast %18 : vector<8x1xf32> to vector<8x256xf32>
    %20 = arith.addf %17, %19 : vector<8x256xf32>
    %cst_16 = arith.constant 0.000000e+00 : f32
    %21 = vector.broadcast %cst_16 : f32 to vector<8x256xf32>
    %22 = arith.maximumf %20, %21 : vector<8x256xf32>
    %c0_17 = arith.constant 0 : index
    %c0_18 = arith.constant 0 : index
    %c0_19 = arith.constant 0 : index
    %23 = vector.load %arg6[%c0_17, %c0_18, %c0_19] : memref<3x8x8xf32, #tpu.memory_space<vmem>>, vector<1x8x8xf32>
    %24 = vector.shape_cast %23 : vector<1x8x8xf32> to vector<8x8xf32>
    %25 = vector.extract_strided_slice %22 {offsets = [0, 0], sizes = [8, 128], strides = [1, 1]} : vector<8x256xf32> to vector<8x128xf32>
    %cst_20 = arith.constant dense<0.000000e+00> : vector<8x128xf32>
    %26 = tpu.matmul %24, %25, %cst_20 {dimension_numbers = #tpu.dot_dimension_numbers<[1], [0], [0], [1], [0, 0, 1, 1], [], []>} : vector<8x8xf32>, vector<8x128xf32>, vector<8x128xf32> -> vector<8x128xf32>
    %c1_21 = arith.constant 1 : index
    %c0_22 = arith.constant 0 : index
    %c0_23 = arith.constant 0 : index
    %27 = vector.load %arg6[%c1_21, %c0_22, %c0_23] : memref<3x8x8xf32, #tpu.memory_space<vmem>>, vector<1x8x8xf32>
    %28 = vector.shape_cast %27 : vector<1x8x8xf32> to vector<8x8xf32>
    %c255_i32_24 = arith.constant 255 : i32
    %29 = tpu.dynamic_rotate %22 by %c255_i32_24 dim 1 : vector<8x256xf32>, i32 -> vector<8x256xf32>
    %30 = vector.extract_strided_slice %29 {offsets = [0, 0], sizes = [8, 128], strides = [1, 1]} : vector<8x256xf32> to vector<8x128xf32>
    %cst_25 = arith.constant dense<0.000000e+00> : vector<8x128xf32>
    %31 = tpu.matmul %28, %30, %cst_25 {dimension_numbers = #tpu.dot_dimension_numbers<[1], [0], [0], [1], [0, 0, 1, 1], [], []>} : vector<8x8xf32>, vector<8x128xf32>, vector<8x128xf32> -> vector<8x128xf32>
    %32 = arith.addf %26, %31 : vector<8x128xf32>
    %c2_26 = arith.constant 2 : index
    %c0_27 = arith.constant 0 : index
    %c0_28 = arith.constant 0 : index
    %33 = vector.load %arg6[%c2_26, %c0_27, %c0_28] : memref<3x8x8xf32, #tpu.memory_space<vmem>>, vector<1x8x8xf32>
    %34 = vector.shape_cast %33 : vector<1x8x8xf32> to vector<8x8xf32>
    %c254_i32_29 = arith.constant 254 : i32
    %35 = tpu.dynamic_rotate %22 by %c254_i32_29 dim 1 : vector<8x256xf32>, i32 -> vector<8x256xf32>
    %36 = vector.extract_strided_slice %35 {offsets = [0, 0], sizes = [8, 128], strides = [1, 1]} : vector<8x256xf32> to vector<8x128xf32>
    %cst_30 = arith.constant dense<0.000000e+00> : vector<8x128xf32>
    %37 = tpu.matmul %34, %36, %cst_30 {dimension_numbers = #tpu.dot_dimension_numbers<[1], [0], [0], [1], [0, 0, 1, 1], [], []>} : vector<8x8xf32>, vector<8x128xf32>, vector<8x128xf32> -> vector<8x128xf32>
    %38 = arith.addf %32, %37 : vector<8x128xf32>
    %c0_31 = arith.constant 0 : index
    %c0_32 = arith.constant 0 : index
    %39 = vector.load %arg7[%c0_31, %c0_32] : memref<8x1xf32, #tpu.memory_space<vmem>>, vector<8x1xf32>
    %40 = vector.broadcast %39 : vector<8x1xf32> to vector<8x128xf32>
    %41 = arith.addf %38, %40 : vector<8x128xf32>
    %cst_33 = arith.constant 0.000000e+00 : f32
    %42 = vector.broadcast %cst_33 : f32 to vector<8x128xf32>
    %43 = arith.maximumf %41, %42 : vector<8x128xf32>
    %c0_34 = arith.constant 0 : index
    %c0_35 = arith.constant 0 : index
    %c0_36 = arith.constant 0 : index
    %44 = vector.load %arg8[%c0_34, %c0_35, %c0_36] : memref<1x8x128xf32, #tpu.memory_space<vmem>>, vector<1x8x128xf32>
    %45 = vector.shape_cast %44 : vector<1x8x128xf32> to vector<8x128xf32>
    %46 = vector.shape_cast %43 : vector<8x128xf32> to vector<1x8x128xf32>
    tpu.vector_store %arg8[%c0_34, %c0_35, %c0_36], %46 {strides = array<i32>} : memref<1x8x128xf32, #tpu.memory_space<vmem>>, vector<1x8x128xf32>,
    return
  }
  func.func @transform_0(%arg0: i32, %arg1: i32) -> (i32, i32, i32) {
    %c0_i32 = arith.constant 0 : i32
    %c0_i32_0 = arith.constant 0 : i32
    return %arg0, %c0_i32, %arg1 : i32, i32, i32
  }
  func.func @transform_1(%arg0: i32, %arg1: i32) -> (i32, i32, i32) {
    %c1_i32 = arith.constant 1 : i32
    %0 = arith.addi %arg1, %c1_i32 : i32
    %c1_i32_0 = arith.constant 1 : i32
    %1 = arith.muli %0, %c1_i32_0 : i32
    %c0_i32 = arith.constant 0 : i32
    %c0_i32_1 = arith.constant 0 : i32
    return %arg0, %c0_i32, %1 : i32, i32, i32
  }
  func.func @transform_2(%arg0: i32, %arg1: i32) -> (i32, i32, i32) {
    %c0_i32 = arith.constant 0 : i32
    %c0_i32_0 = arith.constant 0 : i32
    %c0_i32_1 = arith.constant 0 : i32
    %c0_i32_2 = arith.constant 0 : i32
    return %c0_i32, %c0_i32_0, %c0_i32_1 : i32, i32, i32
  }
  func.func @transform_3(%arg0: i32, %arg1: i32) -> (i32, i32) {
    %c0_i32 = arith.constant 0 : i32
    %c0_i32_0 = arith.constant 0 : i32
    %c0_i32_1 = arith.constant 0 : i32
    return %c0_i32, %c0_i32_0 : i32, i32
  }
  func.func @transform_4(%arg0: i32, %arg1: i32) -> (i32, i32, i32) {
    %c0_i32 = arith.constant 0 : i32
    %c0_i32_0 = arith.constant 0 : i32
    %c0_i32_1 = arith.constant 0 : i32
    %c0_i32_2 = arith.constant 0 : i32
    return %c0_i32, %c0_i32_0, %c0_i32_1 : i32, i32, i32
  }
  func.func @transform_5(%arg0: i32, %arg1: i32) -> (i32, i32) {
    %c0_i32 = arith.constant 0 : i32
    %c0_i32_0 = arith.constant 0 : i32
    %c0_i32_1 = arith.constant 0 : i32
    return %c0_i32, %c0_i32_0 : i32, i32
  }
  func.func @transform_6(%arg0: i32, %arg1: i32) -> (i32, i32, i32) {
    %c0_i32 = arith.constant 0 : i32
    %c0_i32_0 = arith.constant 0 : i32
    return %arg0, %c0_i32, %arg1 : i32, i32, i32
  }
}

</mosaic_0001>

<bundles_post_ra>
// kernel: doubleconv_33.1
= control target key start
LH: loop header
LB: loop body
LE: loop exit
PB: predicated region body
PF: predicated region fallthrough
CT: control target
= control target key end

     0   :  { %11 = vsyncpa [#allocation3], 0  ;;  %s1078_s0 = inlined_call_operand.vmem [shape: f32[2,4,256], index: 0, kind: input, shape index: {}, may-alias: {0,1}]   ;;  %s1079_s1 = inlined_call_operand.vmem [shape: f32[2,4,256], index: 1, kind: input, shape index: {}, may-alias: {0,1}]   ;;  %s1080_s2 = inlined_call_operand.vmem [shape: f32[3,8,4], index: 2, kind: input, shape index: {}]   ;;  %s1081_s3 = inlined_call_operand.vmem [shape: f32[8,1], index: 3, kind: input, shape index: {}]   ;;  %s1082_s4 = inlined_call_operand.vmem [shape: f32[3,8,8], index: 4, kind: input, shape index: {}]   ;;  %s1083_s5 = inlined_call_operand.vmem [shape: f32[8,1], index: 5, kind: input, shape index: {}]   ;;  %s1084_s6 = inlined_call_operand.hbm [shape: f32[2,8,128], index: 6, kind: output, shape index: {}]  }
   0x1   :  { %13 = vsyncpa [#allocation3 + $0x1], 0  ;;  %s927_s21 = smov 0   ;;  %s929_s22 = smov 0  }
   0x2   :  { %s931_s23 = smov 0   ;;  %s933_s24 = smov 0  }
   0x3   :  { %s935_s25 = smov 0   ;;  %s937_s26 = smov 0  }
   0x4 LB: > { %s701_s27 = sadd.s32 4294967295, %s887_s26   ;;  %s702_s28 = sadd.s32 4294967294, %s887_s26   ;;  %s887_s26 = sphi %s937_s26, %s19_s26   ;;  %s883_s25 = sphi %s935_s25, %s1091_s25   ;;  %s879_s24 = sphi %s933_s24, %s1090_s24   ;;  %s875_s23 = sphi %s931_s23, %s1089_s23   ;;  %s871_s22 = sphi %s929_s22, %s1088_s22   ;;  %s867_s21 = sphi %s927_s21, %s1087_s21  }
   0x5   : > { %s31_s29 = sadd.s32 1, %s883_s25  ;;  %s182_s30 = sadd.s32 1, %s875_s23 }
   0x6   : > { %p33_p0 = scmp.ge.s32.totalorder %s31_s29, 2  ;;  %p192_p1 = scmp.ne.s32.totalorder %s875_s23, %s871_s22 }
   0x7   : > { %p193_p2 = scmp.eq.s32.totalorder %s701_s27, 1  ;;  %p198_p3 = scmp.ne.s32.totalorder %s871_s22, %s867_s21 }
   0x8   : > { %s1093_s29 = smov (%p33_p0, %s31_s29), 0  ;;  %p199_p5 = scmp.eq.s32.totalorder %s702_s28, 1 }
   0x9   : > { %p967_p4 = por %p193_p2, %p192_p1  ;;  %s177_s8 = ssub.s32 %s883_s25, %s1093_s29 }
   0xa   : > { %p705_p6 = scmp.ge.s32.totalorder %s887_s26, 1  ;;  %p180_p7 = scmp.eq.s32.totalorder %s177_s8, 0 }
   0xb   : > { %p974_p8 = por %p199_p5, %p198_p3  ;;  %p253_p9 = scmp.lt.s32.totalorder %s887_s26, 3 }
   0xc   : > { %s980_s10 = scalar_select %p180_p7, %s875_s23, %s182_s30  }
   0xd   : > { %p254_p10 = pnand %p705_p6, %p253_p9 }
   0xe   : > { %p295_p11 = scmp.lt.s32.totalorder (!%p254_p10), %s879_s24, 1  ;;  %s889_s17 = smov (!%p254_p10), 126  }
   0xf   : > { %257 = sbr.rel (%p254_p10) target bundleno = 546 (0x222), region = 44  ;;  %s890_s18 = smov (!%p254_p10), 127  }
  0x10   : > { %s292_s8 = sand.u32 (!%p254_p10), 1, %s871_s22   ;;  %s829_s30 = scalar_lea.hbm (!%p254_p10), %s1084_s6, 16 }
  0x14   : > { %s296_s11 = scalar_select %p295_p11, %s879_s24, 1  ;;  %vm331_vm0 = vcmask 1043456   ;;  %v315_v2 = vld [vmem:[%s1080_s2] sm:$0xff]  ;;  %vm327_vm1 = vcmask 31744   ;;  %v891_v4 = vmov 0   ;;  %v322_v5 = vlaneseq  ;;  %v711_v11 = vld [vmem:[%s1080_s2 + $0x8] sm:$0xff] }
  0x15   : > { %v487_v3 = vld [vmem:[%s1081_s3] sm:$0xff]  ;;  %796 = vset.pattern.permute.xlu2 %v891_v4  ;;  %807 = vset.pattern.permute.xlu1 %v891_v4  ;;  %v720_v16 = vld [vmem:[%s1080_s2 + $0x10] sm:$0xff]  ;;  %vm505_vm4 = vcmask 64512   ;;  %v725_v38 = vld [vmem:[%s1082_s4 + $0x8] sm:$0xff] }
  0x16   : > { %s734_s12 = sshll.u32 %s296_s11, 3  ;;  %490 = vperm.xlu2 %796, %v487_v3   ;;  %808 = vset.pattern.permute.xlu0 %v891_v4  ;;  %v323_v8 = vand.u32 127, %v322_v5  ;;  %v497_v33 = vld [vmem:[%s1082_s4] sm:$0xff]  ;;  %v728_v43 = vld [vmem:[%s1082_s4 + $0x10] sm:$0xff]  ;;  %s706_s11 = sshll.u32 %s292_s8, 3 }
  0x17   : > { %s302_s15 = scalar_lea.vmem %s1078_s0, %s734_s12  ;;  %s736_s16 = sadd.s32 4, %s734_s12  ;;  %v583_v34 = vld [vmem:[%s1083_s5] sm:$0xff] }
  0x18   : > { %v313_v0 = vld [vmem:[%s302_s15] sm:$0xf]  ;;  %s311_s27 = scalar_lea.vmem %s1079_s1, %s736_s16  ;;  %vm324_vm2 = vcmp.lt.s32.totalorder %v323_v8, 127  ;;  %vm433_vm3 = vcmp.lt.s32.totalorder %v323_v8, 126  ;;  %s731_s12 = sshll.u32 %s879_s24, 3 }
  0x19   : > { %429 = vrot.lane.b32.xlu1 %v313_v0, %s889_s17  ;;  %318 = vrot.lane.b32.xlu0 %v313_v0, %s890_s18  ;;  %v314_v1 = vld [vmem:[%s311_s27] sm:$0xf]  ;;  %s604_s15 = scalar_lea.hbm %s1084_s6, %s731_s12  ;;  %s294_s16 = scalar_lea.vmem [#allocation2], %s706_s11 }
  0x1a   : > { %716 = vmatpush.msk.msra.mxu2 %vm331_vm0, %v313_v0  ;;  %718 = vmatpush.msk.msra.mxu3 %vm331_vm0, %v314_v1  ;;  %s606_s19 = sshll.u32 %s294_s16, 4  ;;  %s608_s20 = sshll.u32 %s604_s15, 4  ;;  %s607_s19 = int_to_ptr.vmem [resolvable:$true] %s606_s19  ;;  %s609_s20 = int_to_ptr.hbm [resolvable:$true] %s608_s20 }
  0x1b   : > { %717 = vmatmul.msk.f32.vlgmr.msra.gmra.mxu2 %vm327_vm1, %v315_v2  ;;  %719 = vmatmul.msk.f32.vlgmr.msra.gmra.mxu3 %vm327_vm1, %v315_v2  ;;  %s593_s27 = scalar_lea.sflag [#allocation3], %s292_s8  ;;  %s823_s28 = sshra.s32 %s609_s20, 4  ;;  %s824_s28 = int_to_ptr.hbm [resolvable:$true] %s823_s28 }
  0x1c   : > { %s825_s24 = scalar_lea.hbm %s824_s28, 8  ;;  %p830_p1 = scmp.lt.s32.totalorder %s824_s28, %s1084_s6 }
  0x1d   : > { %p826_p12 = scmp.ne.s32.totalorder %s824_s28, %s825_s24  ;;  %p831_p2 = scmp.lt.s32.totalorder %s829_s30, %s825_s24 }
  0x1f   : > { %p827_p13 = pnand %p826_p12, %p967_p4  ;;  %p832_p3 = por %p831_p2, %p830_p1 }
  0x21   : > { %431 = vrot.lane.b32.xlu1 %v314_v1, %s889_s17  ;;  %320 = vrot.lane.b32.xlu0 %v314_v1, %s890_s18  ;;  %p828_p0 = pneg %p827_p13 }
  0x23   : > { %p833_p5 = pnand %p832_p3, %p828_p0 }
  0x29   : > { %586 = vperm.xlu1 %807, %v583_v34  }
  0x70   : > { %v491_v23 = vpop.permute.xlu2 %490 }
  0x8b   : > { %v430_v6 = vpop.permute.xlu1 %429  ;;  %v319_v7 = vpop.permute.xlu0 %318 }
  0x93   : > { %v432_v9 = vpop.permute.xlu1 %431  ;;  %v321_v10 = vpop.permute.xlu0 %320 }
  0x94   : > { %v325_v12 = vsel %vm324_vm2, %v319_v7, %v321_v10  ;;  %v326_v13 = vsel %vm324_vm2, %v321_v10, %v319_v7  ;;  %v434_v14 = vsel %vm433_vm3, %v430_v6, %v432_v9  ;;  %v435_v15 = vsel %vm433_vm3, %v432_v9, %v430_v6 }
  0x95   : > { %712 = vmatpush.msk.msra.mxu0 %vm331_vm0, %v325_v12  ;;  %714 = vmatpush.msk.msra.mxu1 %vm331_vm0, %v326_v13 }
  0x96   : > { %713 = vmatmul.msk.f32.vlgmr.msra.gmra.mxu0 %vm327_vm1, %v711_v11  ;;  %715 = vmatmul.msk.f32.vlgmr.msra.gmra.mxu1 %vm327_vm1, %v711_v11 }
  0x97   : > { %721 = vmatpush.msk.msrb.mxu0 %vm331_vm0, %v434_v14  ;;  %723 = vmatpush.msk.msrb.mxu1 %vm331_vm0, %v435_v15 }
  0x9b   : > { %v587_v49 = vpop.permute.xlu1 %586 }
  0x9e   : > { %722 = vmatmul.msk.f32.vlgmr.msrb.gmra.mxu0 %vm327_vm1, %v720_v16  ;;  %724 = vmatmul.msk.f32.vlgmr.msrb.gmra.mxu1 %vm327_vm1, %v720_v16  ;;  %v404_v19 = vpop.f32.mrf.mxu2  ;;  %v424_v20 = vpop.f32.mrf.mxu3 }
 0x113   : > { %v355_v17 = vpop.f32.mrf.mxu0  ;;  %v375_v18 = vpop.f32.mrf.mxu1 }
 0x114   : > { %v405_v21 = vadd.f32 %v404_v19, %v355_v17  ;;  %v425_v22 = vadd.f32 %v424_v20, %v375_v18 }
 0x11b   : > { %v462_v24 = vpop.f32.mrf.mxu0  ;;  %v482_v25 = vpop.f32.mrf.mxu1 }
 0x11c   : > { %v485_v26 = vadd.f32 %v462_v24, %v405_v21  ;;  %v486_v27 = vadd.f32 %v482_v25, %v425_v22 }
 0x11e   : > { %v493_v28 = vadd.f32 %v491_v23, %v485_v26  ;;  %v494_v29 = vadd.f32 %v491_v23, %v486_v27 }
 0x120   : > { %v495_v30 = vmax.f32 %v493_v28, 0.0  ;;  %v496_v31 = vmax.f32 %v494_v29, 0.0 }
 0x122   : > { %547 = vmatpush.msrb.mxu3 %v495_v30  ;;  %v802_v32 = vpack.i.bf16 %v496_v31, %v495_v30 }
 0x123   : > { %727 = vmatmul.msk.f32.vlgmr.msrb.gmra.mxu3 %vm505_vm4, %v497_v33 }
 0x124   : > { %803 = vrot.lane.b32.xlu0 %v802_v32, %s889_s17  ;;  %798 = vrot.lane.b32.xlu2 %v802_v32, %s890_s18 }
 0x17e   : > { %v799_v35 = vpop.permute.xlu2 %798 }
 0x17f   : > { %v801_v36 = vunpack.i.h.bf16 %v799_v35  ;;  %v800_v37 = vunpack.i.l.bf16 %v799_v35 }
 0x181   : > { %v504_v39 = vsel %vm324_vm2, %v800_v37, %v801_v36 }
 0x182   : > { %524 = vmatpush.msrb.mxu2 %v504_v39 }
 0x183   : > { %726 = vmatmul.msk.f32.vlgmr.msrb.gmra.mxu2 %vm505_vm4, %v725_v38 }
 0x196   : > { %v804_v40 = vpop.permute.xlu0 %803 }
 0x197   : > { %v806_v41 = vunpack.i.h.bf16 %v804_v40  ;;  %v805_v42 = vunpack.i.l.bf16 %v804_v40 }
 0x199   : > { %v558_v44 = vsel %vm433_vm3, %v805_v42, %v806_v41 }
 0x19a   : > { %577 = vmatpush.msra.mxu0 %v558_v44 }
 0x19b   : > { %729 = vmatmul.msk.f32.vlgmr.msra.gmra.mxu0 %vm505_vm4, %v728_v43 }
 0x1a6   : > { %v549_v46 = vpop.f32.mrf.mxu3 }
 0x206   : > { %v526_v45 = vpop.f32.mrf.mxu2 }
 0x207   : > { %v550_v47 = vadd.f32 %v549_v46, %v526_v45 }
 0x218   : > { %v579_v48 = vpop.f32.mrf.mxu0 }
 0x219   : > { %v582_v50 = vadd.f32 %v579_v48, %v550_v47 }
 0x21b   : > { %v589_v51 = vadd.f32 %v587_v49, %v582_v50 }
 0x21d   : > { %v590_v52 = vmax.f32 %v589_v51, 0.0 }
 0x21f   : > { %591 = vst [vmem:[%s294_s16] sm:$0xff] %v590_v52 }
 0x220   : > { %836 = shalt.err (!%p833_p5)
}
 0x221   : > { %738 = dma.vmem_to_hbm [thread:$0]  (%p967_p4), %s607_s19, 128, %s609_s20, %s593_s27  }
 0x222 PF: > { %p744_p6 = scmp.ge.s32.totalorder %s887_s26, 2  ;;  %s620_s8 = sand.u32 1, %s867_s21  }
 0x223   : > { %s621_s13 = scalar_lea.sflag [#allocation3], %s620_s8 }
 0x224   : > { %p741_p7 = pnand %p744_p6, %p974_p8 }
 0x226   : > { %p742_p9 = pneg %p741_p7 }
 0x228   : > { %862 = dma.done.wait (%p742_p9), %s621_s13, 128  }
 0x229   : > { %864 = vsyncadd (%p742_p9), %s621_s13, 4294967168  ;;  %s19_s26 = sadd.s32 1, %s887_s26   ;;  %s1087_s21 = smov %s871_s22 }
 0x22a   : > { %p16_p10 = scmp.ge.s32.totalorder %s19_s26, 4   ;;  %s1088_s22 = smov %s875_s23 }
 0x22b   : > { %s1089_s23 = smov %s980_s10  ;;  %s1090_s24 = smov %s883_s25 }
 0x22c   : > { %s1091_s25 = smov %s1093_s29  ;;  %18 = sbr.rel (!%p16_p10) target bundleno = 4 (0x4), region = 86 }
 0x231   :  { %627 = vsyncpa [#allocation3], 1 }
 0x232   :  { %629 = vsyncpa [#allocation3 + $0x1], 1 }

</bundles_post_ra>
